<compile_context>
chip_gen: v7x
topology: tpu7x:2x2x1
jax: 0.10.0
libtpu: 0.0.40
codegen_flags: <defaults>
</compile_context>

<pallas_src>
import jax
import jax.numpy as jnp
from jax.experimental import pallas as pl
from jax.experimental.pallas import tpu as pltpu


def _round_up(n, m):
    return ((n + m - 1) // m) * m


def _linear_kernel(x_ref, wb_ref, o_ref):
    # x_ref : (K, TB) VMEM input tile, batch on the lane axis (native dtype).
    # wb_ref: (K+1, 1) f32 VMEM params: rows 0..K-1 = weight column, row K = bias.
    # o_ref : (1, TB) f32 VMEM output tile (lane-dense stores).
    k = x_ref.shape[0]
    x = x_ref[...].astype(jnp.float32)                     # one whole-block load (+ upcast)
    wb = wb_ref[...]                                       # (K+1, 1)
    acc = jnp.sum(x * wb[:k, :], axis=0, keepdims=True)    # K-reduction on sublanes (XLU)
    o_ref[...] = acc + wb[k:k + 1, :]                      # (1,1) bias, lane-broadcast


def simple_model_forward(x, weight, bias, *, lane_tile=262144):
    """Pallas equivalent of torch.nn.Linear(3, 1).forward.

    x: (B, 3) or (3,); weight: (1, 3) (PyTorch layout); bias: (1,).
    Returns (B, 1) float32 (or (1,) for a 1-D input), matching the module.
    """
    x = jnp.asarray(x)
    if x.dtype != jnp.bfloat16:              # keep bf16 in HBM; upcast inside the kernel
        x = x.astype(jnp.float32)
    squeeze = x.ndim == 1
    if squeeze:
        x = x[None, :]
    B, K = x.shape
    N, Kw = weight.shape
    assert Kw == K and N == 1, "SimpleModel.fc is Linear(3, 1)"

    x_bytes = jnp.dtype(x.dtype).itemsize
    row_bytes = K * x_bytes + 4              # bytes per batch lane (x tile + y tile)

    # Lane tile: full batch when B <= 128 (full-extent block); otherwise a
    # multiple of 128, capped by `lane_tile`, chosen so the grid has >= 2
    # steps for moderate/large B, and clamped so 2x double-buffered tiles
    # stay well inside VMEM on v5e/v6e/v7x.
    if B <= 128:
        tb = B
    else:
        tb_cap = max(128, _round_up(lane_tile, 128))
        vmem_cap_tb = max(128, ((40 << 20) // (2 * row_bytes)) // 128 * 128)
        tb = min(tb_cap, vmem_cap_tb, _round_up(pl.cdiv(B, 2), 128))
    grid = pl.cdiv(B, tb)

    # Feature-major (K, B) layout: batch on lanes, no padding.
    # TODO(synk): this relayout (one extra HBM pass) disappears if the
    # upstream producer hands activations over feature-major (3, B).
    x_t = x.T

    # Pack weight column + bias into one tiny resident VMEM operand.
    wb = jnp.concatenate(
        [jnp.asarray(weight, jnp.float32).reshape(K, 1),
         jnp.asarray(bias, jnp.float32).reshape(1, 1)], axis=0)        # (K+1, 1)

    step_bytes = tb * row_bytes
    vmem_limit = int(min(max(4 * step_bytes, 32 << 20), 48 << 20))

    out = pl.pallas_call(
        _linear_kernel,
        out_shape=jax.ShapeDtypeStruct((1, B), jnp.float32),
        grid=(grid,),
        in_specs=[
            pl.BlockSpec((K, tb), lambda i: (0, i)),        # pipelined x tile
            pl.BlockSpec((K + 1, 1), lambda i: (0, 0)),     # resident params
        ],
        out_specs=pl.BlockSpec((1, tb), lambda i: (0, i)),  # lane-dense output
        compiler_params=pltpu.CompilerParams(
            dimension_semantics=("parallel",),
            vmem_limit_bytes=vmem_limit),
    )(x_t, wb)

    # (1, B) lane-major row -> (B, 1) column only at the module boundary;
    # layout-agnostic consumers could take out[0] (shape (B,)) directly.
    y = out[0].reshape(B, N)
    return y[0] if squeeze else y


if __name__ == "__main__":
    key = jax.random.PRNGKey(0)
    k_w, k_b, k_x0, k_x1, k_x2, k_x3 = jax.random.split(key, 6)

    IN, OUT = 3, 1
    # Deterministic params mimicking torch.nn.Linear default init U(-1/sqrt(3), 1/sqrt(3)).
    bound = 1.0 / jnp.sqrt(jnp.float32(IN))
    weight = jax.random.uniform(k_w, (OUT, IN), jnp.float32, -bound, bound)
    bias = jax.random.uniform(k_b, (OUT,), jnp.float32, -bound, bound)

    fwd = jax.jit(simple_model_forward, static_argnames=("lane_tile",))

    def ref(xv):
        xv2 = jnp.atleast_2d(xv)
        return (xv2 * weight[0]).sum(axis=-1, keepdims=True) + bias

    # 1) The module's dummy input: a single (3,) vector -> (1,) output.
    x0 = jax.random.uniform(k_x0, (IN,), dtype=jnp.float32)
    y0 = jax.block_until_ready(fwd(x0, weight, bias))
    assert y0.shape == (OUT,)
    assert jnp.allclose(y0, ref(x0)[0], atol=1e-5, rtol=1e-5)

    # 2) Small batch, single full-extent block.
    x1 = jax.random.uniform(k_x1, (8, IN), dtype=jnp.float32)
    y1 = jax.block_until_ready(fwd(x1, weight, bias))
    assert y1.shape == (8, OUT)
    assert jnp.allclose(y1, ref(x1), atol=1e-5, rtol=1e-5)

    # 3) Multi-step pipelined grid with a ragged (partial) last block.
    x2 = jax.random.uniform(k_x2, (1234, IN), dtype=jnp.float32)
    y2 = jax.block_until_ready(fwd(x2, weight, bias, lane_tile=512))
    assert y2.shape == (1234, OUT)
    assert jnp.allclose(y2, ref(x2), atol=1e-5, rtol=1e-5)

    # 4) Default tiling: >= 2 grid steps (v7x both-core path) + ragged tail.
    x3 = jax.random.uniform(k_x3, (50000, IN), dtype=jnp.float32)
    y3 = jax.block_until_ready(fwd(x3, weight, bias))
    assert y3.shape == (50000, OUT)
    assert jnp.allclose(y3, ref(x3), atol=1e-5, rtol=1e-5)

    print("KERNEL_OK")
</pallas_src>

<mosaic_0001>
module attributes {stable_mosaic.version = 11 : i64} {
  func.func @_linear_kernel(%arg0: i32, %arg1: memref<3x1xf32, #tpu.memory_space<vmem>>, %arg2: memref<4x1xf32, #tpu.memory_space<vmem>>, %arg3: memref<1x1xf32, #tpu.memory_space<vmem>>) attributes {dimension_semantics = [#tpu.dimension_semantics<parallel>], iteration_bounds = array<i64: 1>, scalar_prefetch = 0 : i64, scratch_operands = 0 : i64, tpu.core_type = #tpu.core_type<tc>, window_params = [{transform_indices = @transform_0, window_bounds = array<i64: 3, 1>}, {pipeline_mode = #tpu.pipeline_mode<synchronous>, transform_indices = @transform_1, window_bounds = array<i64: 4, 1>}, {transform_indices = @transform_2, window_bounds = array<i64: 1, 1>}]} {
    %c0 = arith.constant 0 : index
    %c0_0 = arith.constant 0 : index
    %0 = vector.load %arg1[%c0, %c0_0] : memref<3x1xf32, #tpu.memory_space<vmem>>, vector<3x1xf32>
    %c0_1 = arith.constant 0 : index
    %c0_2 = arith.constant 0 : index
    %1 = vector.load %arg2[%c0_1, %c0_2] : memref<4x1xf32, #tpu.memory_space<vmem>>, vector<4x1xf32>
    %2 = vector.extract_strided_slice %1 {offsets = [0, 0], sizes = [3, 1], strides = [1, 1]} : vector<4x1xf32> to vector<3x1xf32>
    %3 = arith.mulf %0, %2 : vector<3x1xf32>
    %cst = arith.constant dense<0.000000e+00> : vector<1xf32>
    %4 = vector.multi_reduction <add>, %3, %cst [0] : vector<3x1xf32> to vector<1xf32>
    %5 = vector.shape_cast %4 : vector<1xf32> to vector<1x1xf32>
    %6 = vector.extract_strided_slice %1 {offsets = [3, 0], sizes = [1, 1], strides = [1, 1]} : vector<4x1xf32> to vector<1x1xf32>
    %7 = arith.addf %5, %6 : vector<1x1xf32>
    %c0_3 = arith.constant 0 : index
    %c0_4 = arith.constant 0 : index
    %8 = vector.load %arg3[%c0_3, %c0_4] : memref<1x1xf32, #tpu.memory_space<vmem>>, vector<1x1xf32>
    tpu.vector_store %arg3[%c0_3, %c0_4], %7 {strides = array<i32>} : memref<1x1xf32, #tpu.memory_space<vmem>>, vector<1x1xf32>,
    return
  }
  func.func @transform_0(%arg0: i32) -> (i32, i32) {
    %c0_i32 = arith.constant 0 : i32
    %c0_i32_0 = arith.constant 0 : i32
    return %c0_i32, %arg0 : i32, i32
  }
  func.func @transform_1(%arg0: i32) -> (i32, i32) {
    %c0_i32 = arith.constant 0 : i32
    %c0_i32_0 = arith.constant 0 : i32
    %c0_i32_1 = arith.constant 0 : i32
    return %c0_i32, %c0_i32_0 : i32, i32
  }
  func.func @transform_2(%arg0: i32) -> (i32, i32) {
    %c0_i32 = arith.constant 0 : i32
    %c0_i32_0 = arith.constant 0 : i32
    return %c0_i32, %arg0 : i32, i32
  }
}

</mosaic_0001>

<bundles_post_ra>
// kernel: simple_model_forward.1
= control target key start
LH: loop header
LB: loop body
LE: loop exit
PB: predicated region body
PF: predicated region fallthrough
CT: control target
= control target key end

     0   :  { %vm15_vm0 = vcmask 2048   ;;  %s99_s0 = inlined_call_operand.vmem [shape: f32[3,1], index: 0, kind: input, shape index: {}]   ;;  %s100_s1 = inlined_call_operand.vmem [shape: f32[4,1], index: 1, kind: input, shape index: {}]   ;;  %s101_s2 = inlined_call_operand.hbm [shape: f32[1,1], index: 2, kind: output, shape index: {}]  }
   0x1   :  { %v12_v0 = vld [vmem:[%s99_s0] sm:$0x7] }
   0x2   :  { %v13_v1 = vld [vmem:[%s100_s1] sm:$0xf] }
   0x3   :  { %v14_v2 = vmul.f32 %v13_v1, %v12_v0 }
   0x4   :  { %7 = vsyncpa [#allocation3], 0  ;;  %s65_s13 = smov [#allocation2]   ;;  %vm24_vm1 = vcmask 3075  }
   0x5   :  { %v16_v3 = vsel %vm15_vm0, %v14_v2, 0.0  ;;  %s32_s14 = sshll.u32 %s65_s13, 4  ;;  %s33_s14 = int_to_ptr.vmem [resolvable:$true] %s32_s14 }
   0x6   :  { %v17_v4 = vrot.slane %v16_v3, 4  ;;  %s41_s0 = scalar_lea.vmem %s33_s14, 16  ;;  %s45_s15 = scalar_lea.vmem %s33_s14, 32 }
   0x7   :  { %p42_p0 = scmp.ne.s32.totalorder %s33_s14, %s41_s0  ;;  %p46_p1 = scmp.lt.s32.totalorder %s33_s14, %s33_s14 }
   0x8   :  { %v18_v5 = vadd.f32 %v17_v4, %v16_v3  ;;  %p47_p2 = scmp.lt.s32.totalorder %s45_s15, %s41_s0 }
   0xa   :  { %v19_v6 = vrot.slane %v18_v5, 2  ;;  %p48_p3 = por %p47_p2, %p46_p1 }
   0xc   :  { %v20_v7 = vadd.f32 %v19_v6, %v18_v5  ;;  %p49_p4 = pnand %p48_p3, %p42_p0 }
   0xe   :  { %v21_v8 = vrot.slane %v20_v7, 1 }
  0x10   :  { %v22_v9 = vadd.f32 %v21_v8, %v20_v7 }
  0x12   :  { %v23_v10 = vadd.f32 %v22_v9, %v13_v1 }
  0x14   :  { %25 = vst.msk [vmem:[#allocation2 - $0x3] sm:$0x8] %vm24_vm1, %v23_v10 }
  0x15   :  { %52 = shalt.err (!%p49_p4)
}
  0x16   :  { %s53_s17 = scalar_lea.hbm %s101_s2, 16 }
  0x17   :  { %p54_p5 = scmp.ne.s32.totalorder %s101_s2, %s53_s17  ;;  %p57_p6 = scmp.lt.u32.totalorder %s53_s17, %s101_s2 }
  0x19   :  { %p59_p7 = pnand %p57_p6, %p54_p5 }
  0x1b   :  { %62 = shalt.err (!%p59_p7)
}
  0x1c   :  { %35 = dma.vmem_to_hbm [thread:$0]  %s33_s14, 16, %s101_s2, [#allocation3]  }
  0x1d   :  { %63 = dma.done.wait [#allocation3], 16  }
  0x1e   :  { %64 = vsyncadd [#allocation3], 4294967280 }
  0x1f   :  { %39 = vsyncpa [#allocation3], 1 }

</bundles_post_ra>
